<compile_context>
chip_gen: v5e
topology: v5e:2x2
jax: 0.10.0
libtpu: 0.0.40
codegen_flags: <defaults>
</compile_context>

<pallas_src>
import functools

import jax
import jax.numpy as jnp
from jax import lax
from jax.experimental import pallas as pl
from jax.experimental.pallas import tpu as pltpu

KERNEL_SIZES = (3, 5, 7)
MAX_PAD = (max(KERNEL_SIZES) - 1) // 2  # = 3


# ----------------------------------------------------------------------------
# Fused kernel. One grid step processes `n_img` batch elements.
#   inputs:  patchT (n_img, 49*cin, HW_pad) bf16   im2col patches, transposed, lane-dense
#            wconvT (C, 49*cin)             bf16   packed conv weights (BN folded), transposed
#            pwbdT  (C, C)                  bf16   block-diagonal pixel-attention 1x1, transposed
#            bcol   (C, 3)                  f32    columns: [conv bias, PA bias, fc2 bias]
#            f1wT   (cr, C)                 f32    fc1 weight^T, pre-scaled by 1/(H*W)
#            f1b    (cr, 1)                 f32
#            f2wT   (C, cr)                 f32
#            fwT    (cout, C)               bf16   final 1x1 conv weight^T (BN folded)
#            fb     (cout, 1)               f32    final conv bias (BN folded)
#   output:  o_ref  (n_img, cout, HW_pad)   f32    lane-dense (HW_pad % 128 == 0)
# ----------------------------------------------------------------------------
def _attention_block_kernel(patch_ref, wconv_ref, pwbd_ref, bcol_ref,
                            f1w_ref, f1b_ref, f2w_ref, fwt_ref, fb_ref, o_ref,
                            *, hw_valid):
    n_img = patch_ref.shape[0]
    hw_pad = patch_ref.shape[2]

    b_conv = bcol_ref[:, 0:1]        # (C, 1)
    pb_col = bcol_ref[:, 1:2]        # (C, 1)
    f2b_col = bcol_ref[:, 2:3]       # (C, 1)

    for i in range(n_img):
        pt = patch_ref[i]            # (49*cin, HW_pad) bf16

        # --- all three conv branches, one K=392 MXU matmul, f32 accumulation ----
        acc = jnp.dot(wconv_ref[...], pt,
                      preferred_element_type=jnp.float32)          # (C, HW)
        feat = jnp.maximum(acc + b_conv, 0.0)                       # conv + BN + ReLU

        # --- pixel attention: block-diagonal 1x1 conv for all branches ----------
        pa = jax.nn.sigmoid(
            jnp.dot(pwbd_ref[...], feat.astype(pwbd_ref.dtype),
                    preferred_element_type=jnp.float32) + pb_col)   # (C, HW)
        g = feat * pa                                               # pixel-gated features

        # --- channel attention (pooling scale folded into f1wT) -----------------
        if hw_valid != hw_pad:       # static: only traced when HW was padded
            mask = lax.broadcasted_iota(jnp.int32, g.shape, 1) < hw_valid
            g_pool = jnp.where(mask, g, 0.0)
        else:
            g_pool = g
        pooled = jnp.sum(g_pool, axis=1, keepdims=True)             # (C, 1) lane reduce
        h1 = jnp.maximum(jnp.dot(f1w_ref[...], pooled,
                                 preferred_element_type=jnp.float32)
                         + f1b_ref[...], 0.0)                       # (cr, 1)
        ca = jax.nn.sigmoid(jnp.dot(f2w_ref[...], h1,
                                    preferred_element_type=jnp.float32)
                            + f2b_col)                              # (C, 1)

        # --- channel gate (lane-broadcast) + final 1x1 conv ----------------------
        gc = (g * ca).astype(fwt_ref.dtype)                         # (C, HW) bf16
        y = jnp.dot(fwt_ref[...], gc,
                    preferred_element_type=jnp.float32) + fb_ref[...]
        o_ref[i] = jnp.maximum(y, 0.0)                              # (cout, HW_pad)


# ----------------------------------------------------------------------------
# Weight packing: fold BN (done in init_params), transpose everything to the
# (C, ...) working layout, fold 1/(H*W) into fc1, cast MXU operands to bf16.
# ----------------------------------------------------------------------------
def _pack_params(params, cin, cout, H, W, mxu_dtype=jnp.bfloat16):
    C = len(KERNEL_SIZES) * cin
    kmax = max(KERNEL_SIZES)
    wc = jnp.zeros((kmax, kmax, cin, C), jnp.float32)
    pwbd = jnp.zeros((C, C), jnp.float32)
    b_conv, pb_cat = [], []
    for i, k in enumerate(KERNEL_SIZES):
        off = MAX_PAD - (k - 1) // 2
        wc = wc.at[off:off + k, off:off + k, :, i * cin:(i + 1) * cin].set(params[f"w{k}"])
        pwbd = pwbd.at[i * cin:(i + 1) * cin, i * cin:(i + 1) * cin].set(params[f"pw{i}"])
        b_conv.append(params[f"b{k}"])
        pb_cat.append(params[f"pb{i}"])
    wconv_t = wc.reshape(kmax * kmax * cin, C).T                  # (C, 49*cin)
    pwbd_t = pwbd.T                                               # (C, C)
    bcol = jnp.stack([jnp.concatenate(b_conv),
                      jnp.concatenate(pb_cat),
                      params["f2b"]], axis=1)                     # (C, 3)
    f1w_t = (params["f1w"] * (1.0 / (H * W))).T                   # (cr, C), pooling scale folded
    f1b_col = params["f1b"].reshape(-1, 1)                        # (cr, 1)
    f2w_t = params["f2w"].T                                       # (C, cr)
    fw_t = params["fw"].T                                         # (cout, C)
    fb_col = params["fb"].reshape(-1, 1)                          # (cout, 1)
    return [wconv_t.astype(mxu_dtype), pwbd_t.astype(mxu_dtype), bcol,
            f1w_t, f1b_col, f2w_t, fw_t.astype(mxu_dtype), fb_col]


# ----------------------------------------------------------------------------
# Wrapper: wrapper-side im2col (layout plumbing), lane-dense patch^T, run kernel,
# slice/reshape back to NCHW.
# ----------------------------------------------------------------------------
def attention_block_pallas(x_nchw, params, *, images_per_step=1):
    """x_nchw: (B, Cin, H, W) float32. Returns (B, Cout, H, W) float32.

    images_per_step > 1 amortizes per-grid-step overhead on single-TC chips
    (v5e/v6e); keep it at 1 for small B on v7x so both TensorCores stay busy.
    """
    x = jnp.transpose(x_nchw, (0, 2, 3, 1)).astype(jnp.float32)   # -> NHWC
    B, H, W, cin = x.shape
    cout = params["fw"].shape[1]
    kmax = max(KERNEL_SIZES)
    HW = H * W
    HW_pad = ((HW + 127) // 128) * 128                            # lane-dense last dim

    # --- im2col in the wrapper (XLA), patch^T layout (49*cin, HW) -------------
    x_pad = jnp.pad(x, ((0, 0), (MAX_PAD, MAX_PAD), (MAX_PAD, MAX_PAD), (0, 0)))
    cols = [x_pad[:, dh:dh + H, dw:dw + W, :]
            for dh in range(kmax) for dw in range(kmax)]          # (dh, dw) outer, c inner
    patch = jnp.concatenate(cols, axis=-1).reshape(B, HW, kmax * kmax * cin)
    patch_t = jnp.transpose(patch, (0, 2, 1))                     # (B, 49*cin, HW)
    if HW_pad != HW:
        patch_t = jnp.pad(patch_t, ((0, 0), (0, 0), (0, HW_pad - HW)))
    patch_t = patch_t.astype(jnp.bfloat16)                        # bf16 MXU operand / half DMA

    weights = _pack_params(params, cin, cout, H, W)

    if B % images_per_step != 0:
        images_per_step = 1
    n_img = images_per_step
    grid = (B // n_img,)

    kernel = functools.partial(_attention_block_kernel, hw_valid=HW)

    def _full_spec(a):
        zeros = (0,) * a.ndim
        return pl.BlockSpec(a.shape, lambda b, _z=zeros: _z)

    in_specs = [pl.BlockSpec((n_img, kmax * kmax * cin, HW_pad), lambda b: (b, 0, 0))]
    in_specs += [_full_spec(a) for a in weights]

    out = pl.pallas_call(
        kernel,
        out_shape=jax.ShapeDtypeStruct((B, cout, HW_pad), jnp.float32),
        grid=grid,
        in_specs=in_specs,
        out_specs=pl.BlockSpec((n_img, cout, HW_pad), lambda b: (b, 0, 0)),
        compiler_params=pltpu.CompilerParams(
            dimension_semantics=("parallel",)),      # v7x: shard batch over both TCs
    )(patch_t, *weights)

    return out[:, :, :HW].reshape(B, cout, H, W)     # C(HW) -> CHW: already NCHW


# ----------------------------------------------------------------------------
# Deterministic parameter construction (BatchNorm folded into preceding convs)
# ----------------------------------------------------------------------------
def _fold_bn(w, b, gamma, beta, mean, var, eps=1e-5):
    scale = gamma / jnp.sqrt(var + eps)     # (Cout,)
    return w * scale, (b - mean) * scale + beta


def init_params(key, cin, cout, eps=1e-5):
    C = cin * len(KERNEL_SIZES)
    cr = C // 16
    assert cr >= 1, "in_channels * 3 must be >= 16 for ChannelAttention.fc1"
    keys = iter(jax.random.split(key, 64))

    def nrm(shape, s=0.1):
        return s * jax.random.normal(next(keys), shape, jnp.float32)

    def uni(shape):
        return jax.random.uniform(next(keys), shape, jnp.float32, 0.5, 1.5)

    p = {}
    for i, k in enumerate(KERNEL_SIZES):
        w = nrm((k, k, cin, cin))                    # HWIO conv weight
        b = nrm((cin,))
        g, be, mu, va = uni((cin,)), nrm((cin,)), nrm((cin,)), uni((cin,))
        p[f"w{k}"], p[f"b{k}"] = _fold_bn(w, b, g, be, mu, va, eps)

        pw = nrm((cin, cin))                         # 1x1 conv as matrix
        pb = nrm((cin,))
        g, be, mu, va = uni((cin,)), nrm((cin,)), nrm((cin,)), uni((cin,))
        p[f"pw{i}"], p[f"pb{i}"] = _fold_bn(pw, pb, g, be, mu, va, eps)

    p["f1w"], p["f1b"] = nrm((C, cr)), nrm((cr,))    # Linear(C, C//16)
    p["f2w"], p["f2b"] = nrm((cr, C)), nrm((C,))     # Linear(C//16, C)

    fw, fb = nrm((C, cout)), nrm((cout,))            # final 1x1 conv
    g, be, mu, va = uni((cout,)), nrm((cout,)), nrm((cout,)), uni((cout,))
    p["fw"], p["fb"] = _fold_bn(fw, fb, g, be, mu, va, eps)
    return p


# ----------------------------------------------------------------------------
# Pure-JAX reference (same math as the PyTorch module, eval-mode BN folded)
# ----------------------------------------------------------------------------
def attention_block_reference(x_nchw, params):
    x = jnp.transpose(x_nchw, (0, 2, 3, 1)).astype(jnp.float32)
    feats = []
    for i, k in enumerate(KERNEL_SIZES):
        y = lax.conv_general_dilated(
            x, params[f"w{k}"], (1, 1), "SAME",
            dimension_numbers=("NHWC", "HWIO", "NHWC"),
            precision=lax.Precision.HIGHEST)
        y = jnp.maximum(y + params[f"b{k}"], 0.0)
        pa = jax.nn.sigmoid(
            jnp.einsum("bhwc,cd->bhwd", y, params[f"pw{i}"],
                       precision=lax.Precision.HIGHEST) + params[f"pb{i}"])
        feats.append(y * pa)
    cat = jnp.concatenate(feats, axis=-1)
    pooled = cat.mean(axis=(1, 2))
    h1 = jnp.maximum(pooled @ params["f1w"] + params["f1b"], 0.0)
    ca = jax.nn.sigmoid(h1 @ params["f2w"] + params["f2b"])
    cat = cat * ca[:, None, None, :]
    out = jnp.maximum(
        jnp.einsum("bhwc,cd->bhwd", cat, params["fw"],
                   precision=lax.Precision.HIGHEST) + params["fb"], 0.0)
    return jnp.transpose(out, (0, 3, 1, 2))


if __name__ == "__main__":
    key = jax.random.PRNGKey(0)
    B, Cin, H, W, Cout = 2, 8, 16, 16, 8     # Cin*3 = 24 >= 16 required by fc1

    kp, kx = jax.random.split(key)
    params = init_params(kp, Cin, Cout)
    x = jax.random.normal(kx, (B, Cin, H, W), jnp.float32)

    out = attention_block_pallas(x, params)
    out = jax.block_until_ready(out)
    assert out.shape == (B, Cout, H, W), out.shape

    ref = attention_block_reference(x, params)
    # Kernel matmuls use bf16 MXU operands with f32 accumulation (per the perf review)
    # vs. lax.Precision.HIGHEST f32 in the reference; the dominant term is the K=392
    # fused conv contraction, so a 3e-2 absolute tolerance is used here.
    max_err = float(jnp.max(jnp.abs(out - ref)))
    assert max_err < 3e-2, f"max abs error {max_err}"

    print("KERNEL_OK")
</pallas_src>

<mosaic_0001>
module attributes {stable_mosaic.version = 11 : i64} {
  func.func @_attention_block_kernel(%arg0: i32, %arg1: memref<1x392x256xbf16, #tpu.memory_space<vmem>>, %arg2: memref<24x392xbf16, #tpu.memory_space<vmem>>, %arg3: memref<24x24xbf16, #tpu.memory_space<vmem>>, %arg4: memref<24x3xf32, #tpu.memory_space<vmem>>, %arg5: memref<1x24xf32, #tpu.memory_space<vmem>>, %arg6: memref<1x1xf32, #tpu.memory_space<vmem>>, %arg7: memref<24x1xf32, #tpu.memory_space<vmem>>, %arg8: memref<8x24xbf16, #tpu.memory_space<vmem>>, %arg9: memref<8x1xf32, #tpu.memory_space<vmem>>, %arg10: memref<1x8x256xf32, #tpu.memory_space<vmem>>) attributes {dimension_semantics = [#tpu.dimension_semantics<parallel>], iteration_bounds = array<i64: 2>, scalar_prefetch = 0 : i64, scratch_operands = 0 : i64, tpu.core_type = #tpu.core_type<tc>, window_params = [{transform_indices = @transform_0, window_bounds = array<i64: 1, 392, 256>}, {pipeline_mode = #tpu.pipeline_mode<synchronous>, transform_indices = @transform_1, window_bounds = array<i64: 24, 392>}, {pipeline_mode = #tpu.pipeline_mode<synchronous>, transform_indices = @transform_2, window_bounds = array<i64: 24, 24>}, {pipeline_mode = #tpu.pipeline_mode<synchronous>, transform_indices = @transform_3, window_bounds = array<i64: 24, 3>}, {pipeline_mode = #tpu.pipeline_mode<synchronous>, transform_indices = @transform_4, window_bounds = array<i64: 1, 24>}, {pipeline_mode = #tpu.pipeline_mode<synchronous>, transform_indices = @transform_5, window_bounds = array<i64: 1, 1>}, {pipeline_mode = #tpu.pipeline_mode<synchronous>, transform_indices = @transform_6, window_bounds = array<i64: 24, 1>}, {pipeline_mode = #tpu.pipeline_mode<synchronous>, transform_indices = @transform_7, window_bounds = array<i64: 8, 24>}, {pipeline_mode = #tpu.pipeline_mode<synchronous>, transform_indices = @transform_8, window_bounds = array<i64: 8, 1>}, {transform_indices = @transform_9, window_bounds = array<i64: 1, 8, 256>}]} {
    %c0 = arith.constant 0 : index
    %c0_0 = arith.constant 0 : index
    %0 = vector.load %arg4[%c0, %c0_0] : memref<24x3xf32, #tpu.memory_space<vmem>>, vector<24x1xf32>
    %c0_1 = arith.constant 0 : index
    %c1 = arith.constant 1 : index
    %1 = vector.load %arg4[%c0_1, %c1] : memref<24x3xf32, #tpu.memory_space<vmem>>, vector<24x1xf32>
    %c0_2 = arith.constant 0 : index
    %c2 = arith.constant 2 : index
    %2 = vector.load %arg4[%c0_2, %c2] : memref<24x3xf32, #tpu.memory_space<vmem>>, vector<24x1xf32>
    %c0_3 = arith.constant 0 : index
    %c0_4 = arith.constant 0 : index
    %c0_5 = arith.constant 0 : index
    %3 = vector.load %arg1[%c0_3, %c0_4, %c0_5] : memref<1x392x256xbf16, #tpu.memory_space<vmem>>, vector<1x392x256xbf16>
    %4 = vector.shape_cast %3 : vector<1x392x256xbf16> to vector<392x256xbf16>
    %c0_6 = arith.constant 0 : index
    %c0_7 = arith.constant 0 : index
    %5 = vector.load %arg2[%c0_6, %c0_7] : memref<24x392xbf16, #tpu.memory_space<vmem>>, vector<24x392xbf16>
    %cst = arith.constant dense<0.000000e+00> : vector<24x256xf32>
    %6 = tpu.matmul %5, %4, %cst {dimension_numbers = #tpu.dot_dimension_numbers<[1], [0], [0], [1], [0, 0, 1, 1], [], []>} : vector<24x392xbf16>, vector<392x256xbf16>, vector<24x256xf32> -> vector<24x256xf32>
    %7 = vector.broadcast %0 : vector<24x1xf32> to vector<24x256xf32>
    %8 = arith.addf %6, %7 : vector<24x256xf32>
    %cst_8 = arith.constant 0.000000e+00 : f32
    %9 = vector.broadcast %cst_8 : f32 to vector<24x256xf32>
    %10 = arith.maximumf %8, %9 : vector<24x256xf32>
    %c0_9 = arith.constant 0 : index
    %c0_10 = arith.constant 0 : index
    %11 = vector.load %arg3[%c0_9, %c0_10] : memref<24x24xbf16, #tpu.memory_space<vmem>>, vector<24x24xbf16>
    %12 = arith.truncf %10 : vector<24x256xf32> to vector<24x256xbf16>
    %cst_11 = arith.constant dense<0.000000e+00> : vector<24x256xf32>
    %13 = tpu.matmul %11, %12, %cst_11 {dimension_numbers = #tpu.dot_dimension_numbers<[1], [0], [0], [1], [0, 0, 1, 1], [], []>} : vector<24x24xbf16>, vector<24x256xbf16>, vector<24x256xf32> -> vector<24x256xf32>
    %14 = vector.broadcast %1 : vector<24x1xf32> to vector<24x256xf32>
    %15 = arith.addf %13, %14 : vector<24x256xf32>
    %16 = arith.negf %15 : vector<24x256xf32>
    %17 = math.exp %16 : vector<24x256xf32>
    %cst_12 = arith.constant 1.000000e+00 : f32
    %18 = vector.broadcast %cst_12 : f32 to vector<24x256xf32>
    %19 = arith.addf %18, %17 : vector<24x256xf32>
    %20 = arith.divf %18, %19 : vector<24x256xf32>
    %21 = arith.mulf %10, %20 : vector<24x256xf32>
    %cst_13 = arith.constant dense<0.000000e+00> : vector<24xf32>
    %22 = vector.multi_reduction <add>, %21, %cst_13 [1] : vector<24x256xf32> to vector<24xf32>
    %23 = vector.shape_cast %22 : vector<24xf32> to vector<24x1xf32>
    %c0_14 = arith.constant 0 : index
    %c0_15 = arith.constant 0 : index
    %24 = vector.load %arg5[%c0_14, %c0_15] : memref<1x24xf32, #tpu.memory_space<vmem>>, vector<1x24xf32>
    %cst_16 = arith.constant dense<0.000000e+00> : vector<1x1xf32>
    %25 = tpu.matmul %24, %23, %cst_16 {dimension_numbers = #tpu.dot_dimension_numbers<[1], [0], [0], [1], [0, 0, 1, 1], [], []>} : vector<1x24xf32>, vector<24x1xf32>, vector<1x1xf32> -> vector<1x1xf32>
    %c0_17 = arith.constant 0 : index
    %c0_18 = arith.constant 0 : index
    %26 = vector.load %arg6[%c0_17, %c0_18] : memref<1x1xf32, #tpu.memory_space<vmem>>, vector<1x1xf32>
    %27 = arith.addf %25, %26 : vector<1x1xf32>
    %cst_19 = arith.constant 0.000000e+00 : f32
    %28 = vector.broadcast %cst_19 : f32 to vector<1x1xf32>
    %29 = arith.maximumf %27, %28 : vector<1x1xf32>
    %c0_20 = arith.constant 0 : index
    %c0_21 = arith.constant 0 : index
    %30 = vector.load %arg7[%c0_20, %c0_21] : memref<24x1xf32, #tpu.memory_space<vmem>>, vector<24x1xf32>
    %cst_22 = arith.constant dense<0.000000e+00> : vector<24x1xf32>
    %31 = tpu.matmul %30, %29, %cst_22 {dimension_numbers = #tpu.dot_dimension_numbers<[1], [0], [0], [1], [0, 0, 1, 1], [], []>} : vector<24x1xf32>, vector<1x1xf32>, vector<24x1xf32> -> vector<24x1xf32>
    %32 = arith.addf %31, %2 : vector<24x1xf32>
    %33 = arith.negf %32 : vector<24x1xf32>
    %34 = math.exp %33 : vector<24x1xf32>
    %cst_23 = arith.constant 1.000000e+00 : f32
    %35 = vector.broadcast %cst_23 : f32 to vector<24x1xf32>
    %36 = arith.addf %35, %34 : vector<24x1xf32>
    %37 = arith.divf %35, %36 : vector<24x1xf32>
    %38 = vector.broadcast %37 : vector<24x1xf32> to vector<24x256xf32>
    %39 = arith.mulf %21, %38 : vector<24x256xf32>
    %40 = arith.truncf %39 : vector<24x256xf32> to vector<24x256xbf16>
    %c0_24 = arith.constant 0 : index
    %c0_25 = arith.constant 0 : index
    %41 = vector.load %arg8[%c0_24, %c0_25] : memref<8x24xbf16, #tpu.memory_space<vmem>>, vector<8x24xbf16>
    %cst_26 = arith.constant dense<0.000000e+00> : vector<8x256xf32>
    %42 = tpu.matmul %41, %40, %cst_26 {dimension_numbers = #tpu.dot_dimension_numbers<[1], [0], [0], [1], [0, 0, 1, 1], [], []>} : vector<8x24xbf16>, vector<24x256xbf16>, vector<8x256xf32> -> vector<8x256xf32>
    %c0_27 = arith.constant 0 : index
    %c0_28 = arith.constant 0 : index
    %43 = vector.load %arg9[%c0_27, %c0_28] : memref<8x1xf32, #tpu.memory_space<vmem>>, vector<8x1xf32>
    %44 = vector.broadcast %43 : vector<8x1xf32> to vector<8x256xf32>
    %45 = arith.addf %42, %44 : vector<8x256xf32>
    %cst_29 = arith.constant 0.000000e+00 : f32
    %46 = vector.broadcast %cst_29 : f32 to vector<8x256xf32>
    %47 = arith.maximumf %45, %46 : vector<8x256xf32>
    %c0_30 = arith.constant 0 : index
    %c0_31 = arith.constant 0 : index
    %c0_32 = arith.constant 0 : index
    %48 = vector.load %arg10[%c0_30, %c0_31, %c0_32] : memref<1x8x256xf32, #tpu.memory_space<vmem>>, vector<1x8x256xf32>
    %49 = vector.shape_cast %48 : vector<1x8x256xf32> to vector<8x256xf32>
    %50 = vector.shape_cast %47 : vector<8x256xf32> to vector<1x8x256xf32>
    tpu.vector_store %arg10[%c0_30, %c0_31, %c0_32], %50 {strides = array<i32>} : memref<1x8x256xf32, #tpu.memory_space<vmem>>, vector<1x8x256xf32>,
    return
  }
  func.func @transform_0(%arg0: i32) -> (i32, i32, i32) {
    %c0_i32 = arith.constant 0 : i32
    %c0_i32_0 = arith.constant 0 : i32
    %c0_i32_1 = arith.constant 0 : i32
    return %arg0, %c0_i32, %c0_i32_0 : i32, i32, i32
  }
  func.func @transform_1(%arg0: i32) -> (i32, i32) {
    %c0_i32 = arith.constant 0 : i32
    %c0_i32_0 = arith.constant 0 : i32
    %c0_i32_1 = arith.constant 0 : i32
    return %c0_i32, %c0_i32_0 : i32, i32
  }
  func.func @transform_2(%arg0: i32) -> (i32, i32) {
    %c0_i32 = arith.constant 0 : i32
    %c0_i32_0 = arith.constant 0 : i32
    %c0_i32_1 = arith.constant 0 : i32
    return %c0_i32, %c0_i32_0 : i32, i32
  }
  func.func @transform_3(%arg0: i32) -> (i32, i32) {
    %c0_i32 = arith.constant 0 : i32
    %c0_i32_0 = arith.constant 0 : i32
    %c0_i32_1 = arith.constant 0 : i32
    return %c0_i32, %c0_i32_0 : i32, i32
  }
  func.func @transform_4(%arg0: i32) -> (i32, i32) {
    %c0_i32 = arith.constant 0 : i32
    %c0_i32_0 = arith.constant 0 : i32
    %c0_i32_1 = arith.constant 0 : i32
    return %c0_i32, %c0_i32_0 : i32, i32
  }
  func.func @transform_5(%arg0: i32) -> (i32, i32) {
    %c0_i32 = arith.constant 0 : i32
    %c0_i32_0 = arith.constant 0 : i32
    %c0_i32_1 = arith.constant 0 : i32
    return %c0_i32, %c0_i32_0 : i32, i32
  }
  func.func @transform_6(%arg0: i32) -> (i32, i32) {
    %c0_i32 = arith.constant 0 : i32
    %c0_i32_0 = arith.constant 0 : i32
    %c0_i32_1 = arith.constant 0 : i32
    return %c0_i32, %c0_i32_0 : i32, i32
  }
  func.func @transform_7(%arg0: i32) -> (i32, i32) {
    %c0_i32 = arith.constant 0 : i32
    %c0_i32_0 = arith.constant 0 : i32
    %c0_i32_1 = arith.constant 0 : i32
    return %c0_i32, %c0_i32_0 : i32, i32
  }
  func.func @transform_8(%arg0: i32) -> (i32, i32) {
    %c0_i32 = arith.constant 0 : i32
    %c0_i32_0 = arith.constant 0 : i32
    %c0_i32_1 = arith.constant 0 : i32
    return %c0_i32, %c0_i32_0 : i32, i32
  }
  func.func @transform_9(%arg0: i32) -> (i32, i32, i32) {
    %c0_i32 = arith.constant 0 : i32
    %c0_i32_0 = arith.constant 0 : i32
    %c0_i32_1 = arith.constant 0 : i32
    return %arg0, %c0_i32, %c0_i32_0 : i32, i32, i32
  }
}

</mosaic_0001>

<bundles_post_ra>
// kernel: tpu_custom_call.1
= control target key start
LH: loop header
LB: loop body
LE: loop exit
PB: predicated region body
PF: predicated region fallthrough
CT: control target
= control target key end

     0   :  { %s2484_s0 = inlined_call_operand.hbm [shape: bf16[2,392,256], index: 0, kind: input, shape index: {}]   ;;  %s2485_s1 = inlined_call_operand.vmem [shape: bf16[24,392], index: 1, kind: input, shape index: {}]   ;;  %s2486_s2 = inlined_call_operand.hbm [shape: bf16[24,24], index: 2, kind: input, shape index: {}]   ;;  %s2487_s3 = inlined_call_operand.vmem [shape: f32[24,3], index: 3, kind: input, shape index: {}]   ;;  %s2488_s4 = inlined_call_operand.vmem [shape: f32[1,24], index: 4, kind: input, shape index: {}]   ;;  %s2489_s5 = inlined_call_operand.<no memory space> [shape: f32[1,1], index: 5, kind: input, shape index: {}]   ;;  %s2490_s6 = inlined_call_operand.vmem [shape: f32[24,1], index: 6, kind: input, shape index: {}]   ;;  %s2491_s7 = inlined_call_operand.vmem [shape: bf16[8,24], index: 7, kind: input, shape index: {}]   ;;  %s2492_s8 = inlined_call_operand.vmem [shape: f32[8,1], index: 8, kind: input, shape index: {}]   ;;  %s2493_s9 = inlined_call_operand.hbm [shape: f32[2,8,256], index: 9, kind: output, shape index: {}]  }
   0x1   :  { %2497 = sst [smem:[#allocation15_spill]] %s2486_s2  ;;  %v14_v0 = vstv %s2489_s5 }
   0x2   :  { %15 = vst [vmem:[#allocation2] sm:$0x1] %v14_v0 }
   0x3   :  { %16 = vsyncpa [#allocation4], 0 }
   0x4   :  { %18 = vsyncpa [#allocation4 + $0x1], 0 }
   0x5   :  { %19 = vsyncpa [#allocation7], 0 }
   0x6   :  { %20 = vsyncpa [#allocation5], 0 }
   0x7   :  { %22 = vsyncpa [#allocation5 + $0x1], 0  ;;  %s2000_s11 = smov 0   ;;  %s2002_s12 = smov 0  }
   0x8   :  { %s2004_s13 = smov 0   ;;  %s2006_s14 = smov 0  }
   0x9 LB: > { %2498 = sst [smem:[#allocation12_spill]] %s1933_s13  ;;  %s2021_s5 = sadd.s32 4294967295, %s1937_s14   ;;  %s1937_s14 = sphi %s2006_s14, %s2516_s14   ;;  %s1933_s13 = sphi %s2004_s13, %s2518_s13   ;;  %s1929_s12 = sphi %s2002_s12, %s2520_s12   ;;  %s1925_s11 = sphi %s2000_s11, %s2519_s11  }
   0xa   : > { %s1395_s15 = sadd.s32 4294967294, %s1937_s14   ;;  %p48_p0 = scmp.ne.s32.totalorder %s1929_s12, %s1925_s11 }
   0xb   : > { %p49_p1 = scmp.eq.s32.totalorder %s2021_s5, 0  ;;  %p240_p2 = scmp.eq.s32.totalorder %s2021_s5, 1 }
   0xc   : > { %p246_p3 = scmp.eq.s32.totalorder %s1395_s15, 1  ;;  %p1396_p5 = scmp.ge.s32.totalorder %s1937_s14, 1 }
   0xd   : > { %p2030_p4 = por %p49_p1, %p48_p0  ;;  %p253_p7 = scmp.lt.s32.totalorder %s1937_s14, 3 }
   0xe   : > { %p2035_p6 = por %p246_p3, %p48_p0  ;;  %s2501_s2 = sld [smem:[#allocation15_spill]] }
   0xf   : > { %p2043_p8 = pnand %p1396_p5, %p253_p7  ;;  %s1939_s22 = smov [#allocation6]  }
  0x10   : > { %s269_s23 = sshll.u32 %s1939_s22, 4  ;;  %s2053_s24 = sadd.s32 1, %s1937_s14   ;;  %s270_s23 = int_to_ptr.vmem [resolvable:$true] %s269_s23 }
  0x11   : > { %p1709_p9 = pneg %p2043_p8  ;;  %2503 = sst [smem:[#allocation13_spill]] %s2053_s24 }
  0x12   : > { %s1940_s25 = smov 64   ;;  %s1941_s26 = smov 4  }
  0x13   : > { %p1710_p10 = pnand %p1709_p9, %p49_p1  ;;  %s32_s27 = ssub.s32 %s1937_s14, %s2053_s24 }
  0x14   : > { %s267_s20 = sshll.u32 %s2501_s2, 4  ;;  %s35_s28 = sadd.s32 1, %s1933_s13  ;;  %s268_s20 = int_to_ptr.hbm [resolvable:$true] %s267_s20 }
  0x15   : > { %1712 = dma.hbm_to_vmem [thread:$0]  (!%p1710_p10), %s268_s20, 192, %s270_s23, [#allocation7], %s1940_s25, %s1940_s25, %s1941_s26  }
  0x16   : > { %p33_p12 = scmp.eq.s32.totalorder %s32_s27, 0  ;;  %p42_p13 = scmp.ne.s32.totalorder %s1933_s13, %s1929_s12 }
  0x17   : > { %p43_p0 = scmp.eq.s32.totalorder %s1937_s14, 0  ;;  %p1722_p3 = scmp.lt.s32.totalorder %s1937_s14, 2 }
  0x18   : > { %s2063_s29 = scalar_select %p33_p12, %s1933_s13, %s35_s28  }
  0x19   : > { %p44_p5 = por %p43_p0, %p42_p13  ;;  %p2067_p7 = por %p240_p2, %p42_p13 }
  0x1a   : > { %2504 = sst [smem:[#allocation14_spill]] %s2063_s29  ;;  %s301_s10 = sand.u32 1, %s1933_s13  }
  0x1b   : > { %s1699_s15 = smul.u32 392, %s1937_s14  ;;  %p2076_p9 = pnand %p1722_p3, %p44_p5 }
  0x1c   : > { %s1698_s18 = smul.u32 392, %s301_s10  ;;  %s302_s28 = scalar_lea.sflag [#allocation4], %s301_s10 }
  0x1d   : > { %s310_s20 = scalar_lea.hbm %s2484_s0, %s1699_s15  ;;  %p1841_p10 = pneg %p2076_p9 }
  0x1e   : > { %s311_s25 = sshll.u32 %s310_s20, 4  ;;  %s305_s26 = scalar_lea.vmem [#allocation3], %s1698_s18  ;;  %s312_s25 = int_to_ptr.hbm [resolvable:$true] %s311_s25 }
  0x1f   : > { %s313_s27 = sshll.u32 %s305_s26, 4  ;;  %s1837_s2 = sshra.s32 %s312_s25, 4  ;;  %s314_s27 = int_to_ptr.vmem [resolvable:$true] %s313_s27  ;;  %s1838_s2 = int_to_ptr.hbm [resolvable:$true] %s1837_s2 }
  0x20   : > { %s1839_s29 = scalar_lea.hbm %s1838_s2, 392  ;;  %s1844_s22 = scalar_lea.hbm %s2484_s0, 784 }
  0x21   : > { %p1840_p2 = scmp.ne.s32.totalorder %s1838_s2, %s1839_s29  ;;  %p1845_p0 = scmp.lt.s32.totalorder %s1838_s2, %s2484_s0 }
  0x22   : > { %p1846_p3 = scmp.lt.s32.totalorder %s1844_s22, %s1839_s29 }
  0x23   : > { %p1842_p12 = pnand %p1841_p10, %p1840_p2 }
  0x24   : > { %p1847_p5 = por %p1846_p3, %p1845_p0 }
  0x25   : > { %p1843_p13 = pneg %p1842_p12 }
  0x27   : > { %p1848_p11 = pnand %p1847_p5, %p1843_p13 }
  0x29   : > { %1851 = shalt.err (!%p1848_p11)
}
  0x2a   : > { %s1942_s10 = smov 128   ;;  %s1943_s18 = smov 8  }
  0x2b   : > { %1716 = dma.hbm_to_vmem [thread:$0]  (!%p2076_p9), %s312_s25, 6272, %s314_s27, %s302_s28, %s1942_s10, %s1942_s10, %s1943_s18  }
  0x2c   : > { %325 = sbr.rel (%p2043_p8) target bundleno = 1155 (0x483), region = 56  ;;  %s2093_s20 = sand.u32 (!%p2043_p8), 1, %s1929_s12  }
  0x2d   : > { %s1700_s13 = smul.u32 (!%p2043_p8), 392, %s2093_s20  ;;  %s328_s2 = scalar_lea.sflag (!%p2043_p8), [#allocation4], %s2093_s20 }
  0x2f   : > { %s2097_s24 = scalar_lea.vmem (!%p2043_p8), [#allocation3], %s1700_s13 }
  0x31   : > { %1912 = dma.done.wait (%p2030_p4), %s328_s2, 6272  }
  0x32   : > { %1914 = vsyncadd (%p2030_p4), %s328_s2, 4294961024 }
  0x33   : > { %1916 = dma.done.wait (%p49_p1), [#allocation7], 192  }
  0x34   : > { %1918 = vsyncadd (%p49_p1), [#allocation7], 4294967104  ;;  %v1477_v1 = vld [vmem:[%s2097_s24 + $0x70] sm:$0xf]  ;;  %v1659_v2 = vld [vmem:[%s2097_s24 + $0x74] sm:$0xf0] }
  0x35   : > { %v1541_v3 = vld [vmem:[%s2097_s24 + $0xf0] sm:$0xf]  ;;  %v1478_v4 = vor.u32 %v1659_v2, %v1477_v1  ;;  %v1675_v5 = vld [vmem:[%s2097_s24 + $0xf4] sm:$0xf0]  ;;  %v1469_v10 = vld [vmem:[%s2097_s24 + $0x60] sm:$0xf] }
  0x36   : > { %v1605_v6 = vld [vmem:[%s2097_s24 + $0x170] sm:$0xf]  ;;  %v1691_v7 = vld [vmem:[%s2097_s24 + $0x174] sm:$0xf0]  ;;  %v1542_v8 = vor.u32 %v1675_v5, %v1541_v3  ;;  %v1657_v11 = vld [vmem:[%s2097_s24 + $0x64] sm:$0xf0] }
  0x37   : > { %v1606_v9 = vor.u32 %v1691_v7, %v1605_v6  ;;  %v1533_v12 = vld [vmem:[%s2097_s24 + $0xe0] sm:$0xf]  ;;  %737 = vmatpush.bf16.msra.mxu0 %v1478_v4  ;;  %v1470_v13 = vor.u32 %v1657_v11, %v1469_v10  ;;  %v1673_v14 = vld [vmem:[%s2097_s24 + $0xe4] sm:$0xf0]  ;;  %v1461_v19 = vld [vmem:[%s2097_s24 + $0x50] sm:$0xf] }
  0x38   : > { %v1597_v15 = vld [vmem:[%s2097_s24 + $0x160] sm:$0xf]  ;;  %v1689_v16 = vld [vmem:[%s2097_s24 + $0x164] sm:$0xf0]  ;;  %755 = vmatpush.bf16.msra.mxu1 %v1542_v8  ;;  %v1534_v17 = vor.u32 %v1673_v14, %v1533_v12  ;;  %v1655_v20 = vld [vmem:[%s2097_s24 + $0x54] sm:$0xf0] }
  0x39   : > { %773 = vmatpush.bf16.msra.mxu2 %v1606_v9  ;;  %v1598_v18 = vor.u32 %v1689_v16, %v1597_v15  ;;  %v1525_v21 = vld [vmem:[%s2097_s24 + $0xd0] sm:$0xf]  ;;  %v1671_v22 = vld [vmem:[%s2097_s24 + $0xd4] sm:$0xf0]  ;;  %v1462_v25 = vor.u32 %v1655_v20, %v1461_v19  ;;  %v1453_v26 = vld [vmem:[%s2097_s24 + $0x40] sm:$0xf] }
  0x3a   : > { %v1589_v23 = vld [vmem:[%s2097_s24 + $0x150] sm:$0xf]  ;;  %v1687_v24 = vld [vmem:[%s2097_s24 + $0x154] sm:$0xf0]  ;;  %v1526_v27 = vor.u32 %v1671_v22, %v1525_v21  ;;  %v1653_v29 = vld [vmem:[%s2097_s24 + $0x44] sm:$0xf0] }
  0x3b   : > { %738 = vmatpush.bf16.msra.mxu0 %v1470_v13  ;;  %v1590_v28 = vor.u32 %v1687_v24, %v1589_v23  ;;  %v1517_v30 = vld [vmem:[%s2097_s24 + $0xc0] sm:$0xf]  ;;  %v1669_v32 = vld [vmem:[%s2097_s24 + $0xc4] sm:$0xf0]  ;;  %v1944_v36 = vmov 0   ;;  %vm730_vm0 = vcmask 1043456   ;;  %v1454_v39 = vor.u32 %v1653_v29, %v1453_v26 }
  0x3c   : > { %756 = vmatpush.bf16.msra.mxu1 %v1534_v17  ;;  %v2129_v31 = vld [vmem:[%s2097_s24 + $0x180] sm:$0xff]  ;;  %v1685_v34 = vld [vmem:[%s2097_s24 + $0x144] sm:$0xf0]  ;;  %1765 = vset.pattern.permute.xlu0 %v1944_v36  ;;  %v1415_v38 = vld [vmem:[%s2485_s1 + $0x18] sm:$0xf0]  ;;  %v1518_v44 = vor.u32 %v1669_v32, %v1517_v30  ;;  %vm723_vm1 = vcmask 64512  }
  0x3d   : > { %774 = vmatpush.bf16.msra.mxu2 %v1598_v18  ;;  %v1581_v33 = vld [vmem:[%s2097_s24 + $0x140] sm:$0xf]  ;;  %v623_v35 = vunpack.c.l.b16 %v2129_v31  ;;  %1766 = vset.pattern.permute.xlu1 %v1944_v36  ;;  %v1445_v41 = vld [vmem:[%s2097_s24 + $0x30] sm:$0xf]  ;;  %v1658_v42 = vld [vmem:[%s2097_s24 + $0x74] sm:$0xf] }
  0x3e   : > { %v1693_v37 = vld [vmem:[%s2485_s1 + $0xc] sm:$0xf]  ;;  %v1479_v43 = vld [vmem:[%s2097_s24 + $0x78] sm:$0xf0]  ;;  %v1582_v45 = vor.u32 %v1685_v34, %v1581_v33  ;;  %v1651_v46 = vld [vmem:[%s2097_s24 + $0x34] sm:$0xf0] }
  0x3f   : > { %739 = vmatpush.bf16.msra.mxu0 %v1462_v25  ;;  %v673_v40 = vpack.c.b16 %v623_v35, %v623_v35  ;;  %v1509_v47 = vld [vmem:[%s2097_s24 + $0xb0] sm:$0xf]  ;;  %v1667_v48 = vld [vmem:[%s2097_s24 + $0xb4] sm:$0xf0]  ;;  %v1482_v49 = vor.u32 %v1658_v42, %v1479_v43  ;;  %v2152_v53 = vor.u32 %v1693_v37, %v1415_v38  ;;  %v1656_v54 = vld [vmem:[%s2097_s24 + $0x64] sm:$0xf]  ;;  %v1446_v56 = vor.u32 %v1651_v46, %v1445_v41 }
  0x40   : > { %757 = vmatpush.bf16.msra.mxu1 %v1526_v27  ;;  %v1573_v51 = vld [vmem:[%s2097_s24 + $0x130] sm:$0xf]  ;;  %v1683_v52 = vld [vmem:[%s2097_s24 + $0x134] sm:$0xf0]  ;;  %v1471_v55 = vld [vmem:[%s2097_s24 + $0x68] sm:$0xf0]  ;;  %v1510_v60 = vor.u32 %v1667_v48, %v1509_v47  ;;  %v624_v42 = vunpack.c.h.b16 %v2129_v31 }
  0x41   : > { %775 = vmatpush.bf16.msra.mxu2 %v1590_v28  ;;  %v732_v50 = vsel %vm730_vm0, %v673_v40, 0  ;;  %v1437_v57 = vld [vmem:[%s2097_s24 + $0x20] sm:$0xf]  ;;  %v1649_v58 = vld [vmem:[%s2097_s24 + $0x24] sm:$0xf0]  ;;  %v1474_v59 = vor.u32 %v1656_v54, %v1471_v55  ;;  %v1574_v61 = vor.u32 %v1683_v52, %v1573_v51  ;;  %vm914_vm2 = vcmask 195584  }
  0x42   : > { %798 = vmatpush.bf16.msra.mxu3 %v732_v50  ;;  %v1501_v62 = vld [vmem:[%s2097_s24 + $0xa0] sm:$0xf]  ;;  %v1665_v63 = vld [vmem:[%s2097_s24 + $0xa4] sm:$0xf0]  ;;  %v1654_v0 = vld [vmem:[%s2097_s24 + $0x54] sm:$0xf]  ;;  %v1438_v4 = vor.u32 %v1649_v58, %v1437_v57 }
  0x43   : > { %740 = vmatpush.bf16.msra.mxu0 %v1454_v39  ;;  %v1565_v1 = vld [vmem:[%s2097_s24 + $0x120] sm:$0xf]  ;;  %v1681_v2 = vld [vmem:[%s2097_s24 + $0x124] sm:$0xf0]  ;;  %v1463_v3 = vld [vmem:[%s2097_s24 + $0x58] sm:$0xf0]  ;;  %v1502_v8 = vor.u32 %v1665_v63, %v1501_v62 }
  0x44   : > { %758 = vmatpush.bf16.msra.mxu1 %v1518_v44  ;;  %v1429_v5 = vld [vmem:[%s2097_s24 + $0x10] sm:$0xf]  ;;  %v1647_v6 = vld [vmem:[%s2097_s24 + $0x14] sm:$0xf0]  ;;  %v1466_v7 = vor.u32 %v1654_v0, %v1463_v3  ;;  %v1566_v9 = vor.u32 %v1681_v2, %v1565_v1  ;;  %v1652_v11 = vld [vmem:[%s2097_s24 + $0x44] sm:$0xf] }
  0x45   : > { %776 = vmatpush.bf16.msra.mxu2 %v1582_v45  ;;  %1611 = vmatmul.msk.bf16.vlgmr.msra.gmra.mxu3 %vm723_vm1, %v2152_v53  ;;  %v1493_v10 = vld [vmem:[%s2097_s24 + $0x90] sm:$0xf]  ;;  %v1455_v12 = vld [vmem:[%s2097_s24 + $0x48] sm:$0xf0]  ;;  %v1663_v13 = vld [vmem:[%s2097_s24 + $0x94] sm:$0xf0]  ;;  %v1430_v18 = vor.u32 %v1647_v6, %v1429_v5 }
  0x46   : > { %809 = vmatpush.bf16.msrb.mxu3 %v1482_v49  ;;  %v1557_v14 = vld [vmem:[%s2097_s24 + $0x110] sm:$0xf]  ;;  %v1679_v15 = vld [vmem:[%s2097_s24 + $0x114] sm:$0xf0]  ;;  %v1421_v16 = vld [vmem:[%s2097_s24] sm:$0xf]  ;;  %v1458_v22 = vor.u32 %v1652_v11, %v1455_v12  ;;  %v1494_v23 = vor.u32 %v1663_v13, %v1493_v10 }
  0x47   : > { %741 = vmatpush.bf16.msra.mxu0 %v1446_v56  ;;  %v2178_v17 = vld [vmem:[%s2485_s1 + $0x28] sm:$0xff]  ;;  %v1558_v24 = vor.u32 %v1679_v15, %v1557_v14  ;;  %v1650_v26 = vld [vmem:[%s2097_s24 + $0x34] sm:$0xf]  ;;  %v1694_v33 = vld [vmem:[%s2485_s1 + $0xc] sm:$0xf0]  ;;  %s1946_s18 = smov 126  }
  0x48   : > { %759 = vmatpush.bf16.msra.mxu1 %v1510_v60  ;;  %v1645_v19 = vld [vmem:[%s2097_s24 + $0x4] sm:$0xf0]  ;;  %v1485_v20 = vld [vmem:[%s2097_s24 + $0x80] sm:$0xf]  ;;  %v1447_v27 = vld [vmem:[%s2097_s24 + $0x38] sm:$0xf0]  ;;  %v463_v30 = vunpack.c.h.b16 %v2178_v17  ;;  %v674_v60 = vpack.c.b16 %v624_v42, %v624_v42 }
  0x49   : > { %777 = vmatpush.bf16.msra.mxu2 %v1574_v61  ;;  %v1661_v21 = vld [vmem:[%s2097_s24 + $0x84] sm:$0xf0]  ;;  %v1549_v25 = vld [vmem:[%s2097_s24 + $0x100] sm:$0xf]  ;;  %v1674_v34 = vld [vmem:[%s2097_s24 + $0xf4] sm:$0xf]  ;;  %v1422_v37 = vor.u32 %v1645_v19, %v1421_v16  ;;  %v1450_v41 = vor.u32 %v1650_v26, %v1447_v27  ;;  %v462_v27 = vunpack.c.l.b16 %v2178_v17 }
  0x4a   : > { %810 = vmatpush.bf16.msrb.mxu3 %v1474_v59  ;;  %v1677_v28 = vld [vmem:[%s2097_s24 + $0x104] sm:$0xf0]  ;;  %v1405_v29 = vld [vmem:[%s2485_s1] sm:$0xf]  ;;  %v1692_v38 = vld [vmem:[%s2485_s1 + $0x4] sm:$0xf]  ;;  %v1486_v43 = vor.u32 %v1661_v21, %v1485_v20  ;;  %v2217_v48 = vpack.c.b16 %v463_v30, %v463_v30 }
  0x4b   : > { %742 = vmatpush.bf16.msra.mxu0 %v1438_v4  ;;  %v2194_v32 = vld [vmem:[%s2487_s3 + $0x10] sm:$0xff]  ;;  %v1543_v35 = vld [vmem:[%s2097_s24 + $0xf8] sm:$0xf0]  ;;  %v1550_v44 = vor.u32 %v1677_v28, %v1549_v25  ;;  %v1695_v47 = vld [vmem:[%s2485_s1 + $0x14] sm:$0xf0]  ;;  %v2221_v51 = vor.u32 %v1694_v33, %v1405_v29  ;;  %s1402_s15 = sshll.u32 %s2093_s20, 4 }
  0x4c   : > { %760 = vmatpush.bf16.msra.mxu1 %v1502_v8  ;;  %443 = vperm.xlu0 %1765, %v2194_v32   ;;  %v1690_v39 = vld [vmem:[%s2097_s24 + $0x174] sm:$0xf]  ;;  %v1607_v40 = vld [vmem:[%s2097_s24 + $0x178] sm:$0xf0]  ;;  %v1546_v31 = vor.u32 %v1674_v34, %v1543_v35  ;;  %v1648_v49 = vld [vmem:[%s2097_s24 + $0x24] sm:$0xf] }
  0x4d   : > { %778 = vmatpush.bf16.msra.mxu2 %v1566_v9  ;;  %v1407_v45 = vld [vmem:[%s2485_s1 + $0x10] sm:$0xf0]  ;;  %v1413_v46 = vld [vmem:[%s2485_s1 + $0x8] sm:$0xf]  ;;  %v1610_v52 = vor.u32 %v1690_v39, %v1607_v40  ;;  %v2238_v1 = vld [vmem:[%s2487_s3] sm:$0xff]  ;;  %v735_v8 = vsel %vm730_vm0, %v674_v60, 0  ;;  %v470_v39 = vpack.c.b16 %v462_v27, %v462_v27 }
  0x4e   : > { %811 = vmatpush.bf16.msrb.mxu3 %v1466_v7  ;;  %v1439_v50 = vld [vmem:[%s2097_s24 + $0x28] sm:$0xf0]  ;;  %v1672_v54 = vld [vmem:[%s2097_s24 + $0xe4] sm:$0xf]  ;;  %v2225_v56 = vor.u32 %v1692_v38, %v1407_v45  ;;  %v2227_v57 = vor.u32 %v1695_v47, %v1413_v46  ;;  %v1646_v63 = vld [vmem:[%s2097_s24 + $0x14] sm:$0xf] }
  0x4f   : > { %743 = vmatpush.bf16.msra.mxu0 %v1430_v18  ;;  %v1535_v55 = vld [vmem:[%s2097_s24 + $0xe8] sm:$0xf0]  ;;  %v1688_v58 = vld [vmem:[%s2097_s24 + $0x164] sm:$0xf]  ;;  %v1442_v61 = vor.u32 %v1648_v49, %v1439_v50  ;;  %v1431_v0 = vld [vmem:[%s2097_s24 + $0x18] sm:$0xf0] }
  0x50   : > { %761 = vmatpush.bf16.msra.mxu1 %v1494_v23  ;;  %v1599_v59 = vld [vmem:[%s2097_s24 + $0x168] sm:$0xf0]  ;;  %v1538_v62 = vor.u32 %v1672_v54, %v1535_v55  ;;  %v1670_v3 = vld [vmem:[%s2097_s24 + $0xd4] sm:$0xf]  ;;  %v1527_v4 = vld [vmem:[%s2097_s24 + $0xd8] sm:$0xf0]  ;;  %v1434_v9 = vor.u32 %v1646_v63, %v1431_v0 }
  0x51   : > { %779 = vmatpush.bf16.msra.mxu2 %v1558_v24  ;;  %v1602_v2 = vor.u32 %v1688_v58, %v1599_v59  ;;  %v2246_v5 = vld [vmem:[%s2487_s3 + $0x8] sm:$0xff]  ;;  %v1686_v6 = vld [vmem:[%s2097_s24 + $0x154] sm:$0xf]  ;;  %v1530_v10 = vor.u32 %v1670_v3, %v1527_v4  ;;  %s1697_s19 = sshll.u32 %s2021_s5, 4  ;;  %s1299_s16 = scalar_lea.sflag [#allocation5], %s2093_s20 }
  0x52   : > { %812 = vmatpush.bf16.msrb.mxu3 %v1458_v22  ;;  %v1591_v7 = vld [vmem:[%s2097_s24 + $0x158] sm:$0xf0]  ;;  %v1644_v11 = vld [vmem:[%s2097_s24 + $0x4] sm:$0xf]  ;;  %v1423_v12 = vld [vmem:[%s2097_s24 + $0x8] sm:$0xf0]  ;;  %438 = vperm.xlu1 %1766, %v2246_v5   ;;  %s1310_s10 = scalar_lea.hbm %s2493_s9, %s1697_s19 }
  0x53   : > { %744 = vmatpush.bf16.msra.mxu0 %v1422_v37  ;;  %v1594_v13 = vor.u32 %v1686_v6, %v1591_v7  ;;  %v1668_v14 = vld [vmem:[%s2097_s24 + $0xc4] sm:$0xf]  ;;  %v1519_v15 = vld [vmem:[%s2097_s24 + $0xc8] sm:$0xf0]  ;;  %v1426_v20 = vor.u32 %v1644_v11, %v1423_v12  ;;  %v1666_v24 = vld [vmem:[%s2097_s24 + $0xb4] sm:$0xf] }
  0x54   : > { %762 = vmatpush.bf16.msra.mxu1 %v1486_v43  ;;  %433 = vperm.xlu0 %1765, %v2238_v1   ;;  %v1684_v16 = vld [vmem:[%s2097_s24 + $0x144] sm:$0xf]  ;;  %v1583_v18 = vld [vmem:[%s2097_s24 + $0x148] sm:$0xf0]  ;;  %v1522_v21 = vor.u32 %v1668_v14, %v1519_v15  ;;  %v1511_v25 = vld [vmem:[%s2097_s24 + $0xb8] sm:$0xf0] }
  0x55   : > { %780 = vmatpush.bf16.msra.mxu2 %v1550_v44  ;;  %1612 = vmatmul.msk.bf16.gmra.mxu3 %vm723_vm1, %v2217_v48  ;;  %v429_v19 = vld [vmem:[%s2485_s1 + $0x20] sm:$0xff]  ;;  %v1586_v22 = vor.u32 %v1684_v16, %v1583_v18  ;;  %v1514_v30 = vor.u32 %v1666_v24, %v1511_v25  ;;  %v1503_v37 = vld [vmem:[%s2097_s24 + $0xa8] sm:$0xf0]  ;;  %s1314_s2 = sshll.u32 %s1310_s10, 4  ;;  %s1887_s25 = scalar_lea.hbm %s2493_s9, 32  ;;  %s1315_s2 = int_to_ptr.hbm [resolvable:$true] %s1314_s2 }
  0x56   : > { %813 = vmatpush.bf16.msrb.mxu3 %v1450_v41  ;;  %745 = vmatmul.bf16.vlgmr.msra.gmra.mxu0 %v2221_v51  ;;  %v460_v23 = vunpack.c.l.b16 %v429_v19  ;;  %v461_v26 = vunpack.c.h.b16 %v429_v19  ;;  %v1682_v28 = vld [vmem:[%s2097_s24 + $0x134] sm:$0xf]  ;;  %v1575_v29 = vld [vmem:[%s2097_s24 + $0x138] sm:$0xf0]  ;;  %v1664_v35 = vld [vmem:[%s2097_s24 + $0xa4] sm:$0xf] }
  0x57   : > { %827 = vmatpush.bf16.msrb.mxu0 %v1546_v31  ;;  %763 = vmatmul.bf16.vlgmr.msra.gmra.mxu1 %v2225_v56  ;;  %v1578_v34 = vor.u32 %v1682_v28, %v1575_v29  ;;  %v1680_v40 = vld [vmem:[%s2097_s24 + $0x124] sm:$0xf]  ;;  %v1567_v41 = vld [vmem:[%s2097_s24 + $0x128] sm:$0xf0]  ;;  %v1506_v17 = vor.u32 %v1664_v35, %v1503_v37  ;;  %v1662_v43 = vld [vmem:[%s2097_s24 + $0x94] sm:$0xf] }
  0x58   : > { %845 = vmatpush.bf16.msrb.mxu1 %v1610_v52  ;;  %781 = vmatmul.bf16.vlgmr.msra.gmra.mxu2 %v2227_v57  ;;  %v468_v33 = vpack.c.b16 %v460_v23, %v460_v23  ;;  %v469_v38 = vpack.c.b16 %v461_v26, %v461_v26  ;;  %v1570_v42 = vor.u32 %v1680_v40, %v1567_v41  ;;  %v1495_v44 = vld [vmem:[%s2097_s24 + $0x98] sm:$0xf0]  ;;  %v1678_v45 = vld [vmem:[%s2097_s24 + $0x114] sm:$0xf]  ;;  %v1660_v49 = vld [vmem:[%s2097_s24 + $0x84] sm:$0xf] }
  0x59   : > { %870 = vmatpush.bf16.msrb.mxu2 %v735_v8  ;;  %v1559_v46 = vld [vmem:[%s2097_s24 + $0x118] sm:$0xf0]  ;;  %v1498_v47 = vor.u32 %v1662_v43, %v1495_v44  ;;  %v1487_v50 = vld [vmem:[%s2097_s24 + $0x88] sm:$0xf0]  ;;  %v1945_v40 = vmov 1   ;;  %s1881_s5 = sshra.s32 %s1315_s2, 4  ;;  %s1882_s5 = int_to_ptr.hbm [resolvable:$true] %s1881_s5 }
  0x5a   : > { %814 = vmatpush.bf16.msrb.mxu3 %v1442_v61  ;;  %v1562_v31 = vor.u32 %v1678_v45, %v1559_v46  ;;  %v1551_v52 = vld [vmem:[%s2097_s24 + $0x108] sm:$0xf0]  ;;  %v1490_v54 = vor.u32 %v1660_v49, %v1487_v50  ;;  %1768 = vset.pattern.permute.xlu2 %v1945_v40  ;;  %v889_v43 = vld [vmem:[#allocation6 + $0x8] sm:$0xf]  ;;  %s1883_s21 = scalar_lea.hbm %s1882_s5, 16  ;;  %p1888_p11 = scmp.lt.s32.totalorder %s1882_s5, %s2493_s9 }
  0x5b   : > { %828 = vmatpush.bf16.msrb.mxu0 %v1538_v62  ;;  %v1696_v37 = vld [vmem:[#allocation6] sm:$0xff]  ;;  %1767 = vset.pattern.permute.xlu1 %v1945_v40  ;;  %p1884_p1 = scmp.ne.s32.totalorder %s1882_s5, %s1883_s21  ;;  %p1889_p9 = scmp.lt.s32.totalorder %s1887_s25, %s1883_s21 }
  0x5c   : > { %846 = vmatpush.bf16.msrb.mxu1 %v1602_v2  ;;  %899 = vperm.xlu2 %1768, %v2246_v5  }
  0x5d   : > { %903 = vperm.xlu1 %1767, %v2194_v32   ;;  %p1885_p4 = pnand %p1884_p1, %p2067_p7  ;;  %p1890_p2 = por %p1889_p9, %p1888_p11 }
  0x5e   : > { %815 = vmatpush.bf16.msrb.mxu3 %v1434_v9 }
  0x5f   : > { %829 = vmatpush.bf16.msrb.mxu0 %v1530_v10  ;;  %p1886_p8 = pneg %p1885_p4 }
  0x60   : > { %847 = vmatpush.bf16.msrb.mxu1 %v1594_v13 }
  0x61   : > { %p1891_p10 = pnand %p1890_p2, %p1886_p8 }
  0x62   : > { %816 = vmatpush.bf16.msrb.mxu3 %v1426_v20 }
  0x63   : > { %830 = vmatpush.bf16.msrb.mxu0 %v1522_v21 }
  0x64   : > { %848 = vmatpush.bf16.msrb.mxu1 %v1586_v22  ;;  %895 = vperm.xlu2 %1768, %v2238_v1  }
  0x65   : > { %817 = vmatmul.bf16.vlgmr.msrb.gmra.mxu3 %v2221_v51  ;;  %v1676_v51 = vld [vmem:[%s2097_s24 + $0x104] sm:$0xf]  ;;  %1770 = vset.pattern.permute.xlu1 %v1944_v36 }
  0x66   : > { %750 = vmatmul.bf16.gmra.mxu0 %v468_v33  ;;  %v1554_v55 = vor.u32 %v1676_v51, %v1551_v52 }
  0x67   : > { %831 = vmatpush.bf16.msrb.mxu0 %v1514_v30  ;;  %768 = vmatmul.bf16.gmra.mxu1 %v469_v38 }
  0x68   : > { %849 = vmatpush.bf16.msrb.mxu1 %v1578_v34  ;;  %786 = vmatmul.bf16.gmra.mxu2 %v470_v39 }
  0x6b   : > { %832 = vmatpush.bf16.msrb.mxu0 %v1506_v17 }
  0x6c   : > { %850 = vmatpush.bf16.msrb.mxu1 %v1570_v42  ;;  %1769 = vset.pattern.permute.xlu2 %v1944_v36 }
  0x6f   : > { %833 = vmatpush.bf16.msrb.mxu0 %v1498_v47 }
  0x70   : > { %851 = vmatpush.bf16.msrb.mxu1 %v1562_v31  ;;  %v911_v31 = vunpack.c.l.b16 %v889_v43 }
  0x73   : > { %834 = vmatpush.bf16.msrb.mxu0 %v1490_v54 }
  0x74   : > { %852 = vmatpush.bf16.msrb.mxu1 %v1554_v55  ;;  %v913_v55 = vpack.c.b16 %v911_v31, %v911_v31 }
  0x75   : > { %822 = vmatmul.bf16.gmra.mxu3 %v468_v33 }
  0x76   : > { %835 = vmatmul.bf16.vlgmr.msrb.gmra.mxu0 %v2225_v56 }
  0x77   : > { %853 = vmatmul.bf16.vlgmr.msrb.gmra.mxu1 %v2227_v57 }
  0x78   : > { %1613 = vmatmul.msk.bf16.vlgmr.msrb.gmra.mxu2 %vm723_vm1, %v2152_v53 }
  0x86   : > { %840 = vmatmul.bf16.gmra.mxu0 %v469_v38 }
  0x87   : > { %858 = vmatmul.bf16.gmra.mxu1 %v470_v39 }
  0x88   : > { %1614 = vmatmul.msk.bf16.gmra.mxu2 %vm723_vm1, %v2217_v48 }
  0xbe   : > { %v444_v62 = vpop.permute.xlu0 %443 }
  0xc4   : > { %v439_v57 = vpop.permute.xlu1 %438 }
  0xc6   : > { %v434_v4 = vpop.permute.xlu0 %433 }
  0xc8   : > { %v800_v58 = vpop.f32.mrf.mxu3 }
  0xd0   : > { %v802_v59 = vpop.f32.mrf.mxu3 }
  0xd3   : > { %v746_v60 = vpop.f32.mrf.mxu0 }
  0xd4   : > { %v764_v61 = vpop.f32.mrf.mxu1  ;;  %v747_v53 = vadd.f32 %v746_v60, %v434_v4 }
  0xd6   : > { %v765_v48 = vadd.f32 %v764_v61, %v747_v53 }
  0xd8   : > { %v805_v63 = vpop.f32.mrf.mxu3 }
  0xdb   : > { %v782_v0 = vpop.f32.mrf.mxu2  ;;  %v748_v2 = vpop.f32.mrf.mxu0 }
  0xdc   : > { %v766_v3 = vpop.f32.mrf.mxu1  ;;  %v749_v8 = vadd.f32 %v748_v2, %v439_v57  ;;  %v783_v19 = vadd.f32 %v782_v0, %v765_v48 }
  0xde   : > { %v767_v12 = vadd.f32 %v766_v3, %v749_v8  ;;  %v2292_v24 = vadd.f32 %v800_v58, %v783_v19  ;;  %v900_v8 = vpop.permute.xlu2 %899 }
  0xe0   : > { %v807_v56 = vpop.f32.mrf.mxu3  ;;  %v881_v33 = vmax.f32 %v2292_v24, 0.0 }
  0xe3   : > { %v784_v6 = vpop.f32.mrf.mxu2  ;;  %v751_v7 = vpop.f32.mrf.mxu0 }
  0xe4   : > { %v752_v9 = vadd.f32 %v751_v7, %v444_v62  ;;  %v769_v10 = vpop.f32.mrf.mxu1  ;;  %v785_v14 = vadd.f32 %v784_v6, %v767_v12 }
  0xe6   : > { %v770_v11 = vadd.f32 %v769_v10, %v752_v9  ;;  %v2288_v22 = vadd.f32 %v802_v59, %v785_v14  ;;  %v896_v9 = vpop.permute.xlu2 %895 }
  0xe8   : > { %v818_v13 = vpop.f32.mrf.mxu3  ;;  %v883_v27 = vmax.f32 %v2288_v22, 0.0 }
  0xe9   : > { %v819_v44 = vadd.f32 %v818_v13, %v434_v4 }
  0xea   : > { %v890_v35 = vpack.c.bf16 %v883_v27, %v881_v33 }
  0xeb   : > { %v787_v15 = vpop.f32.mrf.mxu2  ;;  %v753_v18 = vpop.f32.mrf.mxu0 }
  0xec   : > { %v788_v16 = vadd.f32 %v787_v15, %v770_v11  ;;  %v771_v20 = vpop.f32.mrf.mxu1  ;;  %v904_v15 = vpop.permute.xlu1 %903 }
  0xee   : > { %v806_v21 = vadd.f32 %v805_v63, %v788_v16 }
  0xf0   : > { %v2290_v23 = vmax.f32 %v806_v21, 0.0  ;;  %v820_v25 = vpop.f32.mrf.mxu3 }
  0xf1   : > { %v821_v49 = vadd.f32 %v820_v25, %v439_v57 }
  0xf2   : > { %v892_v26 = vpack.c.bf16 %v2290_v23, %v2290_v23 }
  0xf3   : > { %v789_v28 = vpop.f32.mrf.mxu2  ;;  %v836_v29 = vpop.f32.mrf.mxu0 }
  0xf4   : > { %v922_v30 = vsel %vm730_vm0, %v892_v26, 0  ;;  %v854_v34 = vpop.f32.mrf.mxu1  ;;  %v837_v52 = vadd.f32 %v836_v29, %v819_v44 }
  0xf5   : > { %933 = vmatpush.bf16.msra.mxu3 %v922_v30 }
  0xf6   : > { %v855_v59 = vadd.f32 %v854_v34, %v837_v52 }
  0xf8   : > { %v823_v38 = vpop.f32.mrf.mxu3 }
  0xf9   : > { %934 = vmatpush.bf16.msra.mxu3 %v890_v35  ;;  %v824_v46 = vadd.f32 %v823_v38, %v444_v62 }
  0xfb   : > { %v872_v39 = vpop.f32.mrf.mxu2  ;;  %v838_v41 = vpop.f32.mrf.mxu0 }
  0xfc   : > { %1619 = vmatmul.msk.bf16.vlgmr.msra.gmra.mxu3 %vm914_vm2, %v1696_v37  ;;  %v856_v17 = vpop.f32.mrf.mxu1  ;;  %v839_v54 = vadd.f32 %v838_v41, %v821_v49  ;;  %v2314_v56 = vadd.f32 %v872_v39, %v855_v59 }
  0xfe   : > { %v857_v60 = vadd.f32 %v856_v17, %v839_v54  ;;  %v882_v7 = vmax.f32 %v2314_v56, 0.0 }
 0x100   : > { %v825_v42 = vpop.f32.mrf.mxu3 }
 0x103   : > { %v874_v45 = vpop.f32.mrf.mxu2  ;;  %v841_v47 = vpop.f32.mrf.mxu0 }
 0x104   : > { %v859_v50 = vpop.f32.mrf.mxu1  ;;  %v842_v51 = vadd.f32 %v841_v47, %v824_v46  ;;  %v2310_v0 = vadd.f32 %v874_v45, %v857_v60 }
 0x106   : > { %v860_v58 = vadd.f32 %v859_v50, %v842_v51  ;;  %v884_v57 = vmax.f32 %v2310_v0, 0.0 }
 0x108   : > { %v891_v36 = vpack.c.bf16 %v884_v57, %v882_v7 }
 0x10b   : > { %v877_v61 = vpop.f32.mrf.mxu2  ;;  %v843_v62 = vpop.f32.mrf.mxu0 }
 0x10c   : > { %v878_v63 = vadd.f32 %v877_v61, %v860_v58  ;;  %1620 = vmatmul.msk.bf16.gmra.mxu3 %vm914_vm2, %v913_v55  ;;  %v861_v2 = vpop.f32.mrf.mxu1 }
 0x10e   : > { %v2312_v3 = vmax.f32 %v878_v63, 0.0 }
 0x110   : > { %v893_v4 = vpack.c.bf16 %v2312_v3, %v2312_v3 }
 0x112   : > { %v925_v6 = vsel %vm730_vm0, %v893_v4, 0 }
 0x113   : > { %v879_v53 = vpop.f32.mrf.mxu2  ;;  %951 = vmatpush.bf16.msra.mxu0 %v925_v6 }
 0x117   : > { %952 = vmatpush.bf16.msra.mxu0 %v891_v36 }
 0x11a   : > { %1621 = vmatmul.msk.bf16.vlgmr.msra.gmra.mxu0 %vm914_vm2, %v1696_v37 }
 0x12a   : > { %1622 = vmatmul.msk.bf16.gmra.mxu0 %vm914_vm2, %v913_v55 }
 0x17f   : > { %v936_v10 = vpop.f32.mrf.mxu3 }
 0x180   : > { %v937_v11 = vadd.f32 %v936_v10, %v896_v9 }
 0x182   : > { %v1623_v48 = vmul.f32 -1.442695, %v937_v11 }
 0x184   : > { %1771 = vpow2.f32 %v1623_v48 }
 0x187   : > { %v938_v12 = vpop.f32.mrf.mxu3 }
 0x188   : > { %v939_v13 = vadd.f32 %v938_v12, %v900_v8 }
 0x18a   : > { %v1625_v14 = vmul.f32 -1.442695, %v939_v13  ;;  %v1772_v16 = vpop.eup %1771 }
 0x18b   : > { %v981_v20 = vadd.f32 1.0, %v1772_v16 }
 0x18c   : > { %1773 = vpow2.f32 %v1625_v14 }
 0x18d   : > { %1775 = vrcp.f32 %v981_v20  ;;  %vm992_vm3 = vweird.f32 %v981_v20  ;;  %v996_v52 = vand.u32 2147483647, %v981_v20  ;;  %v998_v54 = vand.u32 2147483648, %v981_v20 }
 0x18f   : > { %v941_v18 = vpop.f32.mrf.mxu3  ;;  %vm997_vm6 = vcmp.eq.f32.partialorder %v996_v52, 8.507059e+37  ;;  %v999_v2 = vor.u32 1.1754944e-38, %v998_v54 }
 0x190   : > { %v942_v19 = vadd.f32 %v941_v18, %v904_v15 }
 0x192   : > { %v1627_v21 = vmul.f32 -1.442695, %v942_v19  ;;  %v1774_v25 = vpop.eup %1773 }
 0x193   : > { %v2327_v30 = vadd.f32 1.0, %v1774_v25  ;;  %v1776_v35 = vpop.eup %1775 }
 0x194   : > { %1777 = vpow2.f32 %v1627_v21  ;;  %v988_v39 = vmul.f32 %v1776_v35, %v981_v20  ;;  %vm993_vm4 = vweird.f32 %v1776_v35 }
 0x195   : > { %vm2341_vm5 = vmor %vm992_vm3, %vm993_vm4  ;;  %vm1022_vm8 = vweird.f32 %v2327_v30  ;;  %v1026_v48 = vand.u32 2147483647, %v2327_v30 }
 0x196   : > { %v989_v44 = vsub.f32 1.0, %v988_v39 }
 0x197   : > { %v954_v26 = vpop.f32.mrf.mxu0  ;;  %v943_v28 = vpop.f32.mrf.mxu3  ;;  %vm2373_vm14 = vcmp.eq.f32.partialorder %v1026_v48, 8.507059e+37  ;;  %v1118_v48 = vld [vmem:[%s2490_s6] sm:$0xff] }
 0x198   : > { %v955_v29 = vadd.f32 %v954_v26, %v896_v9  ;;  %v990_v47 = vmul.f32 %v1776_v35, %v989_v44 }
 0x19a   : > { %v1624_v34 = vmul.f32 -1.442695, %v955_v29  ;;  %v1778_v37 = vpop.eup %1777  ;;  %v991_v59 = vadd.f32 %v1776_v35, %v990_v47 }
 0x19b   : > { %v2330_v17 = vadd.f32 1.0, %v1778_v37 }
 0x19c   : > { %1779 = vpow2.f32 %v1624_v34  ;;  %v995_v53 = vsel %vm2341_vm5, %v1776_v35, %v991_v59 }
 0x19d   : > { %1781 = vrcp.f32 %v2327_v30  ;;  %v1000_v13 = vsel %vm997_vm6, %v999_v2, %v995_v53  ;;  %vm1052_vm1 = vweird.f32 %v2330_v17  ;;  %v1058_v47 = vand.u32 2147483648, %v2330_v17 }
 0x19e   : > { %v2367_v34 = vmul.f32 %v1000_v13, %v881_v33 }
 0x19f   : > { %v956_v38 = vpop.f32.mrf.mxu0 }
 0x1a0   : > { %v957_v40 = vadd.f32 %v956_v38, %v900_v8 }
 0x1a2   : > { %v1780_v41 = vpop.eup %1779  ;;  %v1626_v42 = vmul.f32 -1.442695, %v957_v40 }
 0x1a3   : > { %v982_v43 = vadd.f32 1.0, %v1780_v41  ;;  %v2332_v45 = vpop.eup %1781 }
 0x1a4   : > { %1783 = vpow2.f32 %v1626_v42  ;;  %v1018_v31 = vmul.f32 %v2332_v45, %v2327_v30  ;;  %vm1023_vm9 = vweird.f32 %v2332_v45  ;;  %v1056_v42 = vand.u32 2147483647, %v2330_v17 }
 0x1a5   : > { %1785 = vrcp.f32 %v982_v43  ;;  %v1013_v36 = vand.u32 2147483648, %v982_v43  ;;  %v1011_v11 = vand.u32 2147483647, %v982_v43  ;;  %vm1007_vm10 = vweird.f32 %v982_v43  ;;  %vm2360_vm13 = vmor %vm1022_vm8, %vm1023_vm9 }
 0x1a6   : > { %1787 = vrcp.f32 %v2330_v17  ;;  %v1019_v60 = vsub.f32 1.0, %v1018_v31  ;;  %vm1057_vm8 = vcmp.eq.f32.partialorder %v1056_v42, 8.507059e+37 }
 0x1a7   : > { %v959_v46 = vpop.f32.mrf.mxu0  ;;  %v1014_v19 = vor.u32 1.1754944e-38, %v1013_v36  ;;  %vm1012_vm12 = vcmp.eq.f32.partialorder %v1011_v11, 8.507059e+37 }
 0x1a8   : > { %v960_v49 = vadd.f32 %v959_v46, %v904_v15  ;;  %v1020_v8 = vmul.f32 %v2332_v45, %v1019_v60  ;;  %v1028_v15 = vand.u32 2147483648, %v2327_v30 }
 0x1aa   : > { %v1784_v50 = vpop.eup %1783  ;;  %v1628_v51 = vmul.f32 -1.442695, %v960_v49  ;;  %v1021_v20 = vadd.f32 %v2332_v45, %v1020_v8  ;;  %v1029_v39 = vor.u32 1.1754944e-38, %v1028_v15  ;;  %v1092_v8 = vld [vmem:[%s2488_s4] sm:$0x1] }
 0x1ab   : > { %v1786_v55 = vpop.eup %1785  ;;  %v2337_v58 = vadd.f32 1.0, %v1784_v50 }
 0x1ac   : > { %v2339_v61 = vpop.eup %1787  ;;  %1789 = vpow2.f32 %v1628_v51  ;;  %v1003_v62 = vmul.f32 %v1786_v55, %v982_v43  ;;  %vm1008_vm7 = vweird.f32 %v1786_v55  ;;  %v1025_v38 = vsel %vm2360_vm13, %v2332_v45, %v1021_v20 }
 0x1ad   : > { %1791 = vrcp.f32 %v2337_v58  ;;  %v1048_v9 = vmul.f32 %v2339_v61, %v2330_v17  ;;  %vm1009_vm11 = vmor %vm1007_vm10, %vm1008_vm7  ;;  %v1043_v40 = vand.u32 2147483648, %v2337_v58  ;;  %vm1053_vm3 = vweird.f32 %v2339_v61 }
 0x1ae   : > { %v1004_v4 = vsub.f32 1.0, %v1003_v62  ;;  %vm1037_vm4 = vweird.f32 %v2337_v58  ;;  %v1030_v44 = vsel %vm2373_vm14, %v1029_v39, %v1025_v38  ;;  %vm2393_vm7 = vmor %vm1052_vm1, %vm1053_vm3  ;;  %vm1140_vm13 = vcmask 1040384  }
 0x1af   : > { %v961_v6 = vpop.f32.mrf.mxu0  ;;  %v1049_v21 = vsub.f32 1.0, %v1048_v9  ;;  %v1044_v45 = vor.u32 1.1754944e-38, %v1043_v40  ;;  %v2399_v52 = vmul.f32 %v1030_v44, %v883_v27  ;;  %vm1130_vm14 = vcmask 7168  }
 0x1b0   : > { %v1005_v10 = vmul.f32 %v1786_v55, %v1004_v4 }
 0x1b1   : > { %v1050_v24 = vmul.f32 %v2339_v61, %v1049_v21 }
 0x1b2   : > { %v1790_v12 = vpop.eup %1789  ;;  %v1006_v14 = vadd.f32 %v1786_v55, %v1005_v10 }
 0x1b3   : > { %v1792_v16 = vpop.eup %1791  ;;  %v986_v18 = vadd.f32 1.0, %v1790_v12  ;;  %v1051_v46 = vadd.f32 %v2339_v61, %v1050_v24 }
 0x1b4   : > { %v1010_v25 = vsel %vm1009_vm11, %v1786_v55, %v1006_v14  ;;  %v1033_v28 = vmul.f32 %v1792_v16, %v2337_v58  ;;  %vm1038_vm15 = vweird.f32 %v1792_v16 }
 0x1b5   : > { %1793 = vrcp.f32 %v986_v18  ;;  %v1015_v29 = vsel %vm1012_vm12, %v1014_v19, %v1010_v25  ;;  %vm1039_vm5 = vmor %vm1037_vm4, %vm1038_vm15  ;;  %v1055_v17 = vsel %vm2393_vm7, %v2339_v61, %v1051_v46  ;;  %v1073_v59 = vand.u32 2147483648, %v986_v18 }
 0x1b6   : > { %v2371_v35 = vmul.f32 %v1015_v29, %v882_v7  ;;  %v1034_v30 = vsub.f32 1.0, %v1033_v28  ;;  %v1041_v7 = vand.u32 2147483647, %v2337_v58  ;;  %v1059_v58 = vor.u32 1.1754944e-38, %v1058_v47 }
 0x1b7   : > { %v1071_v22 = vand.u32 2147483647, %v986_v18  ;;  %vm1067_vm10 = vweird.f32 %v986_v18 }
 0x1b8   : > { %v1083_v33 = vadd.f32 %v2371_v35, %v2367_v34  ;;  %v1035_v56 = vmul.f32 %v1792_v16, %v1034_v30  ;;  %vm1042_vm6 = vcmp.eq.f32.partialorder %v1041_v7, 8.507059e+37  ;;  %v1060_v0 = vsel %vm1057_vm8, %v1059_v58, %v1055_v17 }
 0x1b9   : > { %vm1072_vm12 = vcmp.eq.f32.partialorder %v1071_v22, 8.507059e+37  ;;  %v2411_v61 = vmul.f32 %v1060_v0, %v2290_v23  ;;  %v1093_v23 = vld [vmem:[#allocation2] sm:$0x1] }
 0x1ba   : > { %1084 = vadd.xlane.f32.xlu2 %v1083_v33  ;;  %v1036_v41 = vadd.f32 %v1792_v16, %v1035_v56 }
 0x1bb   : > { %v1794_v43 = vpop.eup %1793 }
 0x1bc   : > { %v1040_v31 = vsel %vm1039_vm5, %v1792_v16, %v1036_v41  ;;  %v1063_v50 = vmul.f32 %v1794_v43, %v986_v18  ;;  %vm1068_vm9 = vweird.f32 %v1794_v43 }
 0x1bd   : > { %v1045_v51 = vsel %vm1042_vm6, %v1044_v45, %v1040_v31  ;;  %vm1069_vm11 = vmor %vm1067_vm10, %vm1068_vm9 }
 0x1be   : > { %v2403_v54 = vmul.f32 %v1045_v51, %v884_v57  ;;  %v1064_v55 = vsub.f32 1.0, %v1063_v50  ;;  %v1074_v57 = vor.u32 1.1754944e-38, %v1073_v59 }
 0x1c0   : > { %v1086_v60 = vadd.f32 %v2403_v54, %v2399_v52  ;;  %v1065_v63 = vmul.f32 %v1794_v43, %v1064_v55 }
 0x1c2   : > { %1087 = vadd.xlane.f32.xlu1 %v1086_v60  ;;  %v1066_v27 = vadd.f32 %v1794_v43, %v1065_v63 }
 0x1c4   : > { %v1070_v62 = vsel %vm1069_vm11, %v1794_v43, %v1066_v27 }
 0x1c5   : > { %v1075_v2 = vsel %vm1072_vm12, %v1074_v57, %v1070_v62 }
 0x1c6   : > { %v2414_v4 = vmul.f32 %v1075_v2, %v2312_v3 }
 0x1c8   : > { %v1089_v6 = vadd.f32 %v2414_v4, %v2411_v61 }
 0x1ca   : > { %1090 = vadd.xlane.f32.xlu0 %v1089_v6 }
 0x1d2   : > { %1125 = vrot.lane.b32.xlu2 %v2194_v32, %s1946_s18  ;;  %v1120_v32 = vld [vmem:[%s2490_s6 + $0x10] sm:$0xff] }
 0x1db   : > { %1123 = vrot.lane.b32.xlu1 %v2246_v5, %s1946_s18 }
 0x1de   : > { %1121 = vrot.lane.b32.xlu0 %v2238_v1, %s1946_s18  ;;  %v1119_v1 = vld [vmem:[%s2490_s6 + $0x8] sm:$0xff]  ;;  %s371_s18 = scalar_lea.vmem [#allocation8], %s1402_s15 }
 0x1df   : > { %s1312_s13 = sshll.u32 %s371_s18, 4  ;;  %s1313_s13 = int_to_ptr.vmem [resolvable:$true] %s1312_s13 }
 0x22d   : > { %v1085_v9 = vpop.xlane.xlu2 %1084 }
 0x235   : > { %v1088_v36 = vpop.xlane.xlu1 %1087  ;;  %v1126_v25 = vpop.permute.xlu2 %1125 }
 0x23d   : > { %v1091_v53 = vpop.xlane.xlu0 %1090 }
 0x23e   : > { %1110 = vmatpush.msra.mxu1 %v1091_v53 }
 0x240   : > { %1111 = vmatpush.msra.mxu1 %v1088_v36  ;;  %v1253_v36 = vld [vmem:[%s2492_s8] sm:$0xff] }
 0x242   : > { %1112 = vmatpush.msra.mxu1 %v1085_v9 }
 0x243   : > { %1629 = vmatmul.msk.f32.vlgmr.msra.gmra.mxu1 %vm914_vm2, %v1092_v8 }
 0x24d   : > { %v1124_v15 = vpop.permute.xlu1 %1123 }
 0x250   : > { %v1122_v5 = vpop.permute.xlu0 %1121 }
 0x2c0   : > { %v1114_v3 = vpop.f32.mrf.mxu1 }
 0x2c1   : > { %v1115_v10 = vadd.f32 %v1114_v3, %v1093_v23 }
 0x2c3   : > { %v1117_v11 = vmax.f32 %v1115_v10, 0.0 }
 0x2c5   : > { %1630 = vmatpush.msk.msra.mxu2 %vm1140_vm13, %v1117_v11 }
 0x2c6   : > { %1631 = vmatmul.msk.f32.vlgmr.msra.gmra.mxu2 %vm1130_vm14, %v1118_v48 }
 0x2ce   : > { %1632 = vmatmul.msk.f32.gmra.mxu2 %vm1130_vm14, %v1119_v1 }
 0x2d6   : > { %1633 = vmatmul.msk.f32.gmra.mxu2 %vm1130_vm14, %v1120_v32 }
 0x349   : > { %v1161_v12 = vpop.f32.mrf.mxu2 }
 0x34a   : > { %v1162_v13 = vadd.f32 %v1161_v12, %v1122_v5 }
 0x34c   : > { %v1634_v14 = vmul.f32 -1.442695, %v1162_v13 }
 0x34e   : > { %1795 = vpow2.f32 %v1634_v14 }
 0x351   : > { %v1164_v16 = vpop.f32.mrf.mxu2 }
 0x352   : > { %v1165_v18 = vadd.f32 %v1164_v16, %v1124_v15 }
 0x354   : > { %v1796_v19 = vpop.eup %1795  ;;  %v1635_v20 = vmul.f32 -1.442695, %v1165_v18 }
 0x355   : > { %v1179_v21 = vadd.f32 1.0, %v1796_v19 }
 0x356   : > { %1797 = vpow2.f32 %v1635_v20 }
 0x357   : > { %1799 = vrcp.f32 %v1179_v21  ;;  %v1193_v24 = vand.u32 2147483648, %v1179_v21  ;;  %v1191_v56 = vand.u32 2147483647, %v1179_v21  ;;  %vm1187_vm1 = vweird.f32 %v1179_v21 }
 0x359   : > { %v1167_v26 = vpop.f32.mrf.mxu2  ;;  %v1194_v44 = vor.u32 1.1754944e-38, %v1193_v24  ;;  %vm1192_vm4 = vcmp.eq.f32.partialorder %v1191_v56, 8.507059e+37 }
 0x35a   : > { %v1168_v28 = vadd.f32 %v1167_v26, %v1126_v25 }
 0x35c   : > { %v1798_v29 = vpop.eup %1797  ;;  %v1636_v37 = vmul.f32 -1.442695, %v1168_v28 }
 0x35d   : > { %v1800_v30 = vpop.eup %1799  ;;  %v1180_v38 = vadd.f32 1.0, %v1798_v29 }
 0x35e   : > { %1801 = vpow2.f32 %v1636_v37  ;;  %v1183_v39 = vmul.f32 %v1800_v30, %v1179_v21  ;;  %vm1188_vm15 = vweird.f32 %v1800_v30 }
 0x35f   : > { %1803 = vrcp.f32 %v1180_v38  ;;  %vm1189_vm3 = vmor %vm1187_vm1, %vm1188_vm15  ;;  %v1208_v49 = vand.u32 2147483648, %v1180_v38  ;;  %v1206_v51 = vand.u32 2147483647, %v1180_v38  ;;  %vm1202_vm6 = vweird.f32 %v1180_v38 }
 0x360   : > { %v1184_v40 = vsub.f32 1.0, %v1183_v39 }
 0x361   : > { %v1209_v58 = vor.u32 1.1754944e-38, %v1208_v49  ;;  %vm1207_vm8 = vcmp.eq.f32.partialorder %v1206_v51, 8.507059e+37 }
 0x362   : > { %v1185_v33 = vmul.f32 %v1800_v30, %v1184_v40 }
 0x364   : > { %v1802_v7 = vpop.eup %1801  ;;  %v1186_v41 = vadd.f32 %v1800_v30, %v1185_v33 }
 0x365   : > { %v1804_v42 = vpop.eup %1803  ;;  %v1181_v43 = vadd.f32 1.0, %v1802_v7 }
 0x366   : > { %v1190_v45 = vsel %vm1189_vm3, %v1800_v30, %v1186_v41  ;;  %v1198_v46 = vmul.f32 %v1804_v42, %v1180_v38  ;;  %vm1203_vm5 = vweird.f32 %v1804_v42 }
 0x367   : > { %1805 = vrcp.f32 %v1181_v43  ;;  %v1195_v47 = vsel %vm1192_vm4, %v1194_v44, %v1190_v45  ;;  %vm1204_vm7 = vmor %vm1202_vm6, %vm1203_vm5  ;;  %v1223_v27 = vand.u32 2147483648, %v1181_v43  ;;  %v1221_v57 = vand.u32 2147483647, %v1181_v43 }
 0x368   : > { %1229 = vperm.xlu2 %1769, %v1195_v47   ;;  %v1199_v31 = vsub.f32 1.0, %v1198_v46  ;;  %vm1217_vm10 = vweird.f32 %v1181_v43 }
 0x369   : > { %v1224_v2 = vor.u32 1.1754944e-38, %v1223_v27  ;;  %vm1222_vm12 = vcmp.eq.f32.partialorder %v1221_v57, 8.507059e+37 }
 0x36a   : > { %v1200_v50 = vmul.f32 %v1804_v42, %v1199_v31 }
 0x36c   : > { %v1201_v55 = vadd.f32 %v1804_v42, %v1200_v50 }
 0x36d   : > { %v1806_v17 = vpop.eup %1805 }
 0x36e   : > { %v1205_v59 = vsel %vm1204_vm7, %v1804_v42, %v1201_v55  ;;  %v1213_v60 = vmul.f32 %v1806_v17, %v1181_v43  ;;  %vm1218_vm9 = vweird.f32 %v1806_v17 }
 0x36f   : > { %v1210_v63 = vsel %vm1207_vm8, %v1209_v58, %v1205_v59  ;;  %vm1219_vm11 = vmor %vm1217_vm10, %vm1218_vm9 }
 0x370   : > { %1234 = vperm.xlu1 %1770, %v1210_v63   ;;  %v1214_v22 = vsub.f32 1.0, %v1213_v60 }
 0x372   : > { %v1215_v0 = vmul.f32 %v1806_v17, %v1214_v22 }
 0x374   : > { %v1216_v62 = vadd.f32 %v1806_v17, %v1215_v0 }
 0x376   : > { %v1220_v6 = vsel %vm1219_vm11, %v1806_v17, %v1216_v62 }
 0x377   : > { %v1225_v53 = vsel %vm1222_vm12, %v1224_v2, %v1220_v6 }
 0x378   : > { %1239 = vperm.xlu0 %1765, %v1225_v53  }
 0x380   : > { %1256 = vperm.xlu0 %1765, %v1253_v36  }
 0x3c2   : > { %v1230_v10 = vpop.permute.xlu2 %1229 }
 0x3c3   : > { %v1242_v13 = vmul.f32 %v1230_v10, %v2367_v34  ;;  %v1243_v14 = vmul.f32 %v1230_v10, %v2371_v35 }
 0x3e2   : > { %v1235_v9 = vpop.permute.xlu1 %1234 }
 0x3e3   : > { %v1244_v1 = vmul.f32 %v1235_v9, %v2399_v52  ;;  %v1245_v32 = vmul.f32 %v1235_v9, %v2403_v54  ;;  %v1252_v52 = vld [vmem:[%s2491_s7] sm:$0xf] }
 0x3ea   : > { %v1240_v8 = vpop.permute.xlu0 %1239 }
 0x3eb   : > { %v1246_v23 = vmul.f32 %v1240_v8, %v2411_v61  ;;  %v1247_v3 = vmul.f32 %v1240_v8, %v2414_v4  ;;  %v1248_v61 = vpack.c.bf16 %v1244_v1, %v1242_v13  ;;  %v1249_v4 = vpack.c.bf16 %v1245_v32, %v1243_v14 }
 0x3ed   : > { %v1250_v11 = vpack.c.bf16 %v1246_v23, %v1246_v23  ;;  %v1251_v48 = vpack.c.bf16 %v1247_v3, %v1247_v3 }
 0x3ef   : > { %v1263_v5 = vsel %vm730_vm0, %v1250_v11, 0  ;;  %v1266_v12 = vsel %vm730_vm0, %v1251_v48, 0 }
 0x3f0   : > { %1274 = vmatpush.bf16.msrb.mxu3 %v1263_v5  ;;  %1287 = vmatpush.bf16.msrb.mxu1 %v1266_v12 }
 0x3f2   : > { %v1257_v54 = vpop.permute.xlu0 %1256 }
 0x3f4   : > { %1275 = vmatpush.bf16.msrb.mxu3 %v1248_v61  ;;  %1288 = vmatpush.bf16.msrb.mxu1 %v1249_v4 }
 0x3f7   : > { %1637 = vmatmul.msk.bf16.vlgmr.msrb.gmra.mxu3 %vm914_vm2, %v1252_v52  ;;  %1638 = vmatmul.msk.bf16.vlgmr.msrb.gmra.mxu1 %vm914_vm2, %v1252_v52 }
 0x474   : > { %v1290_v15 = vpop.f32.mrf.mxu1 }
 0x475   : > { %v1291_v34 = vadd.f32 %v1290_v15, %v1257_v54 }
 0x477   : > { %v1295_v35 = vmax.f32 %v1291_v34, 0.0 }
 0x479   : > { %1297 = vst [vmem:[%s371_s18 + $0x8] sm:$0xff] %v1295_v35 }
 0x47a   : > { %v1277_v16 = vpop.f32.mrf.mxu3 }
 0x47b   : > { %v1278_v18 = vadd.f32 %v1277_v16, %v1257_v54 }
 0x47c   : > { %v1292_v19 = vpop.f32.mrf.mxu1 }
 0x47d   : > { %v1294_v20 = vmax.f32 %v1278_v18, 0.0 }
 0x47f   : > { %1296 = vst [vmem:[%s371_s18] sm:$0xff] %v1294_v20 }
 0x480   : > { %1894 = shalt.err (!%p1891_p10)
}
 0x481   : > { %1707 = dma.vmem_to_hbm [thread:$0]  (%p2067_p7), %s1313_s13, 256, %s1315_s2, %s1299_s16  }
 0x482   : > { %v1279_v21 = vpop.f32.mrf.mxu3 }
 0x483 PF: > { %s1326_s20 = sand.u32 1, %s1925_s11   ;;  %p2515_p12 = scmp.ge.s32.totalorder %s1937_s14, 2 }
 0x484   : > { %s1327_s28 = scalar_lea.sflag [#allocation5], %s1326_s20 }
 0x485   : > { %p1718_p13 = pnand %p2515_p12, %p2035_p6 }
 0x487   : > { %p1719_p0 = pneg %p1718_p13 }
 0x489   : > { %1920 = dma.done.wait (%p1719_p0), %s1327_s28, 256  }
 0x48a   : > { %1922 = vsyncadd (%p1719_p0), %s1327_s28, 4294967040  ;;  %s2516_s14 = sld [smem:[#allocation13_spill]]  ;;  %s2519_s11 = smov %s1929_s12 }
 0x48b   : > { %s2517_s15 = sld [smem:[#allocation12_spill]] }
 0x48c   : > { %s2518_s13 = sld [smem:[#allocation14_spill]] }
 0x490   : > { %p25_p3 = scmp.ge.s32.totalorder %s2516_s14, 4  }
 0x491   : > { %s2520_s12 = smov %s2517_s15 }
 0x492   :  { %27 = sbr.rel (!%p25_p3) target bundleno = 9 (0x9), region = 105 }
 0x497   :  { %1333 = vsyncpa [#allocation4], 1 }
 0x498   :  { %1335 = vsyncpa [#allocation4 + $0x1], 1 }
 0x499   :  { %1336 = vsyncpa [#allocation7], 1 }
 0x49a   :  { %1337 = vsyncpa [#allocation5], 1 }
 0x49b   :  { %1339 = vsyncpa [#allocation5 + $0x1], 1 }

</bundles_post_ra>
